<compile_context>
chip_gen: v6e
topology: v6e:2x2x1
jax: 0.10.0
libtpu: 0.0.40
codegen_flags: <defaults>
</compile_context>

<pallas_src>
import functools

import jax
import jax.numpy as jnp
from jax import lax
from jax.experimental import pallas as pl
from jax.experimental.pallas import tpu as pltpu

_LANE = 128


def _glob_block_kernel(x_ref, w1_ref, b1_ref, w2_ref, b2_ref, o_ref, *,
                       identity, nb, n_strips, strip, mm_dtype):
    # x_ref : (nb, Cin,  tl)   channels on sublanes, positions on lanes
    # w1_ref: (hidden, Cin)
    # b1_ref: (hidden, 1)      f32
    # w2_ref: (Cout, hidden)   already pre-scaled by 1/6 (HSwish fold)
    # b2_ref: (Cout, 1)        f32
    # o_ref : (nb, Cout, tl)
    w1 = w1_ref[...]
    b1 = b1_ref[...]
    w2 = w2_ref[...]
    b2 = b2_ref[...]

    for n in range(nb):  # nb is a small compile-time constant (unrolled)

        def strip_body(si, carry, n=n):
            s0 = pl.multiple_of(si * strip, strip)
            xb = x_ref[n, :, pl.ds(s0, strip)]            # (Cin, strip)

            # conv1: (hidden, Cin) @ (Cin, strip), f32 MXU accumulate
            h = jnp.dot(w1, xb, preferred_element_type=jnp.float32) + b1

            # HSwish numerator: h * relu6(h + 3)   (the 1/6 is folded into w2)
            h = h * jnp.clip(h + 3.0, 0.0, 6.0)

            # conv2: (Cout, hidden) @ (hidden, strip)
            y = jnp.dot(w2, h.astype(mm_dtype),
                        preferred_element_type=jnp.float32) + b2

            if identity:
                y = y + xb.astype(jnp.float32)

            o_ref[n, :, pl.ds(s0, strip)] = y.astype(o_ref.dtype)
            return carry

        lax.fori_loop(0, n_strips, strip_body, 0, unroll=True)


def _largest_divisor_leq(n, cap):
    cap = max(1, min(n, cap))
    for d in range(cap, 0, -1):
        if n % d == 0:
            return d
    return 1


def glob_block(x_ncthw, w1, b1, w2, b2, *,
               target_step_bytes=8 << 20, max_lane_tile=4096):
    """Apply GlobBlock.

    x_ncthw: (N, Cin, T, H, W)
    w1: (hidden, Cin)   conv1 weight (PyTorch Conv3d weight squeezed)
    b1: (hidden,)
    w2: (Cout, hidden)  conv2 weight
    b2: (Cout,)
    """
    N, Cin, T, H, W = x_ncthw.shape
    hidden = w1.shape[0]
    Cout = w2.shape[0]
    identity = Cin == Cout
    S = T * H * W
    itemsize = jnp.dtype(x_ncthw.dtype).itemsize
    col_bytes = (Cin + Cout) * itemsize     # HBM bytes per (batch, lane) column

    # Double-buffered (in + out) blocks must stay well under the 48 MiB cap.
    io_step_budget = 20 << 20

    # ---- lane tile: full S when small, else a multiple of 128 (lane-dense
    # stores; ragged last tile is handled by the cdiv grid + masked writes).
    tl_cap = max(_LANE, (io_step_budget // max(col_bytes, 1)) // _LANE * _LANE)
    if S <= min(max_lane_tile, tl_cap):
        tl = S
    else:
        tl = max(_LANE, (min(max_lane_tile, tl_cap) // _LANE) * _LANE)
    grid_s = pl.cdiv(S, tl)

    # ---- batch tile: amortize the ~0.35us/step pipeline overhead by moving
    # ~target_step_bytes of HBM traffic per grid step (sized for v7x's
    # 3.2 TB/s roofline; more than enough on v5e/v6e).  Nb divides N exactly
    # so there is never a ragged batch block.
    per_n_bytes = tl * col_bytes
    nb_cap = int(min(target_step_bytes, io_step_budget) // max(per_n_bytes, 1))
    Nb = _largest_divisor_leq(N, nb_cap)
    grid_n = N // Nb

    # ---- megacore: v7x has 2 TensorCores -> make sure there are >= 2 steps.
    if grid_n * grid_s == 1:
        if N >= 2:
            Nb = _largest_divisor_leq(N, N // 2)
            grid_n = N // Nb
        elif S >= 2 * _LANE:
            tl = max(_LANE, ((S // 2) // _LANE) * _LANE)
            grid_s = pl.cdiv(S, tl)

    # ---- lane strip inside the kernel: keep the f32 (hidden, strip)
    # intermediate in vregs instead of round-tripping through VMEM.
    if tl % _LANE != 0 or hidden * tl * 4 <= (256 << 10):
        strip = tl
    else:
        strip_cap = max(_LANE, ((64 * 1024) // max(hidden, 1)) // _LANE * _LANE)
        strip = min(tl, 512, strip_cap)
        strip = max(_LANE, (strip // _LANE) * _LANE)
        while tl % strip != 0:
            strip -= _LANE
    n_strips = tl // strip

    # ---- kernel-side operand prep
    w1_k = w1                                                        # (hidden, Cin)
    b1_k = b1.reshape(hidden, 1).astype(jnp.float32)
    # Fold the HSwish 1/6 into w2 (done in f32, cast back once; deviation from
    # PyTorch is a single extra rounding step for sub-f32 weight dtypes).
    w2_k = (w2.astype(jnp.float32) * (1.0 / 6.0)).astype(w2.dtype)
    b2_k = b2.reshape(Cout, 1).astype(jnp.float32)
    mm_dtype = (jnp.bfloat16
                if (x_ncthw.dtype == jnp.bfloat16 and w2.dtype == jnp.bfloat16)
                else jnp.float32)

    # (N, Cin, T, H, W) -> (N, Cin, S): pure reshape, no HBM transpose.
    x_rows = x_ncthw.reshape(N, Cin, S)

    # ---- VMEM limit: double-buffered I/O + weights + f32 intermediates +
    # slack, capped at 48 MiB (headroom under v7x's 64 MiB physical VMEM).
    weight_bytes = (hidden * Cin * jnp.dtype(w1.dtype).itemsize
                    + Cout * hidden * jnp.dtype(w2.dtype).itemsize
                    + (hidden + Cout) * 4)
    io_block_bytes = Nb * tl * col_bytes
    interm_bytes = 2 * (hidden + Cout) * strip * 4
    vmem_needed = 2 * io_block_bytes + 2 * weight_bytes + interm_bytes + (2 << 20)
    vmem_limit = int(min(48 << 20, max(vmem_needed, 8 << 20)))

    # Advisory cost estimate so XLA can schedule around this mem-bound call.
    flops = 2 * N * S * (Cin * hidden + hidden * Cout) + 4 * N * S * hidden
    bytes_accessed = itemsize * N * S * (Cin + Cout) + weight_bytes
    cost = pl.CostEstimate(flops=int(flops), transcendentals=0,
                           bytes_accessed=int(bytes_accessed))

    kernel = functools.partial(
        _glob_block_kernel, identity=identity, nb=Nb,
        n_strips=n_strips, strip=strip, mm_dtype=mm_dtype)

    out_rows = pl.pallas_call(
        kernel,
        out_shape=jax.ShapeDtypeStruct((N, Cout, S), x_ncthw.dtype),
        grid_spec=pltpu.PrefetchScalarGridSpec(
            num_scalar_prefetch=0,
            grid=(grid_n, grid_s),
            in_specs=[
                pl.BlockSpec((Nb, Cin, tl), lambda n, s: (n, 0, s)),
                pl.BlockSpec((hidden, Cin), lambda n, s: (0, 0)),
                pl.BlockSpec((hidden, 1), lambda n, s: (0, 0)),
                pl.BlockSpec((Cout, hidden), lambda n, s: (0, 0)),
                pl.BlockSpec((Cout, 1), lambda n, s: (0, 0)),
            ],
            out_specs=pl.BlockSpec((Nb, Cout, tl), lambda n, s: (n, 0, s)),
        ),
        compiler_params=pltpu.CompilerParams(
            dimension_semantics=("parallel", "parallel"),
            vmem_limit_bytes=vmem_limit),
        cost_estimate=cost,
    )(x_rows, w1_k, b1_k, w2_k, b2_k)

    # (N, Cout, S) -> (N, Cout, T, H, W): pure reshape, no transpose.
    return out_rows.reshape(N, Cout, T, H, W)


def glob_block_ref(x_ncthw, w1, b1, w2, b2):
    """Pure-JAX reference matching the PyTorch forward."""
    Cin = x_ncthw.shape[1]
    Cout = w2.shape[0]
    x = jnp.transpose(x_ncthw, (0, 2, 3, 4, 1)).astype(jnp.float32)
    h = jnp.einsum('nthwc,oc->nthwo', x, w1.astype(jnp.float32)) + b1
    h = h * jnp.clip(h + 3.0, 0.0, 6.0) / 6.0
    y = jnp.einsum('nthwc,oc->nthwo', h, w2.astype(jnp.float32)) + b2
    if Cin == Cout:
        y = y + x
    return jnp.transpose(y, (0, 4, 1, 2, 3)).astype(x_ncthw.dtype)


def _run_case(key, N, Cin, Cout, T, H, W, factor=3, max_lane_tile=4096):
    k_x, k_w1, k_b1, k_w2, k_b2 = jax.random.split(key, 5)
    hidden = factor * Cin
    x = jax.random.normal(k_x, (N, Cin, T, H, W), dtype=jnp.float32)
    w1 = jax.random.normal(k_w1, (hidden, Cin), dtype=jnp.float32) * 0.1
    b1 = jax.random.normal(k_b1, (hidden,), dtype=jnp.float32) * 0.1
    w2 = jax.random.normal(k_w2, (Cout, hidden), dtype=jnp.float32) * 0.1
    b2 = jax.random.normal(k_b2, (Cout,), dtype=jnp.float32) * 0.1

    out = jax.block_until_ready(
        glob_block(x, w1, b1, w2, b2, max_lane_tile=max_lane_tile))
    ref = glob_block_ref(x, w1, b1, w2, b2)
    assert out.shape == (N, Cout, T, H, W), (out.shape, (N, Cout, T, H, W))
    err = float(jnp.max(jnp.abs(out - ref)))
    assert jnp.allclose(out, ref, atol=2e-5, rtol=2e-5), err
    return err


if __name__ == "__main__":
    key = jax.random.PRNGKey(0)
    k1, k2, k3 = jax.random.split(key, 3)

    # Identity branch (in_planes == out_planes): N=2, C=4, hidden=12, T=4, H=W=8.
    _run_case(k1, N=2, Cin=4, Cout=4, T=4, H=8, W=8)

    # Non-identity branch (in_planes != out_planes).
    _run_case(k2, N=2, Cin=4, Cout=8, T=4, H=8, W=8)

    # Ragged lane path (S=240, not a multiple of 128) + batched Nb>1 block:
    # exercises masked last-tile writeback and the in-kernel batch loop.
    _run_case(k3, N=2, Cin=4, Cout=4, T=3, H=5, W=16, max_lane_tile=128)

    print("KERNEL_OK")
</pallas_src>

<mosaic_0001>
module attributes {stable_mosaic.version = 11 : i64} {
  func.func @_glob_block_kernel(%arg0: i32, %arg1: i32, %arg2: memref<1x4x256xf32, #tpu.memory_space<vmem>>, %arg3: memref<12x4xf32, #tpu.memory_space<vmem>>, %arg4: memref<12x1xf32, #tpu.memory_space<vmem>>, %arg5: memref<4x12xf32, #tpu.memory_space<vmem>>, %arg6: memref<4x1xf32, #tpu.memory_space<vmem>>, %arg7: memref<1x4x256xf32, #tpu.memory_space<vmem>>) attributes {dimension_semantics = [#tpu.dimension_semantics<parallel>, #tpu.dimension_semantics<parallel>], iteration_bounds = array<i64: 2, 1>, scalar_prefetch = 0 : i64, scratch_operands = 0 : i64, tpu.core_type = #tpu.core_type<tc>, window_params = [{transform_indices = @transform_0, window_bounds = array<i64: 1, 4, 256>}, {pipeline_mode = #tpu.pipeline_mode<synchronous>, transform_indices = @transform_1, window_bounds = array<i64: 12, 4>}, {pipeline_mode = #tpu.pipeline_mode<synchronous>, transform_indices = @transform_2, window_bounds = array<i64: 12, 1>}, {pipeline_mode = #tpu.pipeline_mode<synchronous>, transform_indices = @transform_3, window_bounds = array<i64: 4, 12>}, {pipeline_mode = #tpu.pipeline_mode<synchronous>, transform_indices = @transform_4, window_bounds = array<i64: 4, 1>}, {transform_indices = @transform_5, window_bounds = array<i64: 1, 4, 256>}]} {
    %c0 = arith.constant 0 : index
    %c0_0 = arith.constant 0 : index
    %0 = vector.load %arg3[%c0, %c0_0] : memref<12x4xf32, #tpu.memory_space<vmem>>, vector<12x4xf32>
    %c0_1 = arith.constant 0 : index
    %c0_2 = arith.constant 0 : index
    %1 = vector.load %arg4[%c0_1, %c0_2] : memref<12x1xf32, #tpu.memory_space<vmem>>, vector<12x1xf32>
    %c0_3 = arith.constant 0 : index
    %c0_4 = arith.constant 0 : index
    %2 = vector.load %arg5[%c0_3, %c0_4] : memref<4x12xf32, #tpu.memory_space<vmem>>, vector<4x12xf32>
    %c0_5 = arith.constant 0 : index
    %c0_6 = arith.constant 0 : index
    %3 = vector.load %arg6[%c0_5, %c0_6] : memref<4x1xf32, #tpu.memory_space<vmem>>, vector<4x1xf32>
    %c0_i32 = arith.constant 0 : i32
    %c256_i32 = arith.constant 256 : i32
    %4 = arith.muli %c0_i32, %c256_i32 : i32
    %5 = tpu.assume_multiple %4, 256 : i32
    %c0_7 = arith.constant 0 : index
    %c0_8 = arith.constant 0 : index
    %6 = arith.index_cast %5 : i32 to index
    %7 = vector.load %arg2[%c0_7, %c0_8, %6] : memref<1x4x256xf32, #tpu.memory_space<vmem>>, vector<1x4x256xf32>
    %8 = vector.shape_cast %7 : vector<1x4x256xf32> to vector<4x256xf32>
    %cst = arith.constant dense<0.000000e+00> : vector<12x256xf32>
    %9 = tpu.matmul %0, %8, %cst {dimension_numbers = #tpu.dot_dimension_numbers<[1], [0], [0], [1], [0, 0, 1, 1], [], []>} : vector<12x4xf32>, vector<4x256xf32>, vector<12x256xf32> -> vector<12x256xf32>
    %10 = vector.broadcast %1 : vector<12x1xf32> to vector<12x256xf32>
    %11 = arith.addf %9, %10 : vector<12x256xf32>
    %cst_9 = arith.constant 3.000000e+00 : f32
    %12 = vector.broadcast %cst_9 : f32 to vector<12x256xf32>
    %13 = arith.addf %11, %12 : vector<12x256xf32>
    %cst_10 = arith.constant 0.000000e+00 : f32
    %cst_11 = arith.constant 6.000000e+00 : f32
    %14 = vector.broadcast %cst_10 : f32 to vector<12x256xf32>
    %15 = arith.maximumf %14, %13 : vector<12x256xf32>
    %16 = vector.broadcast %cst_11 : f32 to vector<12x256xf32>
    %17 = arith.minimumf %16, %15 : vector<12x256xf32>
    %18 = arith.mulf %11, %17 : vector<12x256xf32>
    %cst_12 = arith.constant dense<0.000000e+00> : vector<4x256xf32>
    %19 = tpu.matmul %2, %18, %cst_12 {dimension_numbers = #tpu.dot_dimension_numbers<[1], [0], [0], [1], [0, 0, 1, 1], [], []>} : vector<4x12xf32>, vector<12x256xf32>, vector<4x256xf32> -> vector<4x256xf32>
    %20 = vector.broadcast %3 : vector<4x1xf32> to vector<4x256xf32>
    %21 = arith.addf %19, %20 : vector<4x256xf32>
    %22 = arith.addf %21, %8 : vector<4x256xf32>
    %c0_13 = arith.constant 0 : index
    %c0_14 = arith.constant 0 : index
    %23 = arith.index_cast %5 : i32 to index
    %24 = vector.load %arg7[%c0_13, %c0_14, %23] : memref<1x4x256xf32, #tpu.memory_space<vmem>>, vector<1x4x256xf32>
    %25 = vector.shape_cast %24 : vector<1x4x256xf32> to vector<4x256xf32>
    %26 = vector.shape_cast %22 : vector<4x256xf32> to vector<1x4x256xf32>
    tpu.vector_store %arg7[%c0_13, %c0_14, %23], %26 {strides = array<i32>} : memref<1x4x256xf32, #tpu.memory_space<vmem>>, vector<1x4x256xf32>,
    %c1_i32 = arith.constant 1 : i32
    return
  }
  func.func @transform_0(%arg0: i32, %arg1: i32) -> (i32, i32, i32) {
    %c0_i32 = arith.constant 0 : i32
    %c0_i32_0 = arith.constant 0 : i32
    return %arg0, %c0_i32, %arg1 : i32, i32, i32
  }
  func.func @transform_1(%arg0: i32, %arg1: i32) -> (i32, i32) {
    %c0_i32 = arith.constant 0 : i32
    %c0_i32_0 = arith.constant 0 : i32
    %c0_i32_1 = arith.constant 0 : i32
    return %c0_i32, %c0_i32_0 : i32, i32
  }
  func.func @transform_2(%arg0: i32, %arg1: i32) -> (i32, i32) {
    %c0_i32 = arith.constant 0 : i32
    %c0_i32_0 = arith.constant 0 : i32
    %c0_i32_1 = arith.constant 0 : i32
    return %c0_i32, %c0_i32_0 : i32, i32
  }
  func.func @transform_3(%arg0: i32, %arg1: i32) -> (i32, i32) {
    %c0_i32 = arith.constant 0 : i32
    %c0_i32_0 = arith.constant 0 : i32
    %c0_i32_1 = arith.constant 0 : i32
    return %c0_i32, %c0_i32_0 : i32, i32
  }
  func.func @transform_4(%arg0: i32, %arg1: i32) -> (i32, i32) {
    %c0_i32 = arith.constant 0 : i32
    %c0_i32_0 = arith.constant 0 : i32
    %c0_i32_1 = arith.constant 0 : i32
    return %c0_i32, %c0_i32_0 : i32, i32
  }
  func.func @transform_5(%arg0: i32, %arg1: i32) -> (i32, i32, i32) {
    %c0_i32 = arith.constant 0 : i32
    %c0_i32_0 = arith.constant 0 : i32
    return %arg0, %c0_i32, %arg1 : i32, i32, i32
  }
}

</mosaic_0001>

<bundles_post_ra>
// kernel: tpu_custom_call.1
= control target key start
LH: loop header
LB: loop body
LE: loop exit
PB: predicated region body
PF: predicated region fallthrough
CT: control target
= control target key end

     0   :  { %10 = vsyncpa [#allocation3], 0  ;;  %s879_s0 = inlined_call_operand.vmem [shape: f32[2,4,256], index: 0, kind: input, shape index: {}]   ;;  %s880_s1 = inlined_call_operand.vmem [shape: f32[12,4], index: 1, kind: input, shape index: {}]   ;;  %s881_s2 = inlined_call_operand.vmem [shape: f32[12,1], index: 2, kind: input, shape index: {}]   ;;  %s882_s3 = inlined_call_operand.vmem [shape: f32[4,12], index: 3, kind: input, shape index: {}]   ;;  %s883_s4 = inlined_call_operand.vmem [shape: f32[4,1], index: 4, kind: input, shape index: {}]   ;;  %s884_s5 = inlined_call_operand.hbm [shape: f32[2,4,256], index: 5, kind: output, shape index: {}]  }
   0x1   :  { %12 = vsyncpa [#allocation3 + $0x1], 0  ;;  %s758_s18 = smov 0   ;;  %s760_s19 = smov 0  }
   0x2   :  { %s762_s20 = smov 0   ;;  %s764_s21 = smov 0  }
   0x3   :  { %s766_s22 = smov 0   ;;  %s768_s23 = smov 0  }
   0x4 LB: > { %s565_s24 = sadd.s32 4294967295, %s723_s23   ;;  %s566_s25 = sadd.s32 4294967294, %s723_s23   ;;  %s723_s23 = sphi %s768_s23, %s18_s23   ;;  %s719_s22 = sphi %s766_s22, %s891_s22   ;;  %s715_s21 = sphi %s764_s21, %s890_s21   ;;  %s711_s20 = sphi %s762_s20, %s889_s20   ;;  %s707_s19 = sphi %s760_s19, %s888_s19   ;;  %s703_s18 = sphi %s758_s18, %s887_s18  }
   0x5   : > { %s30_s26 = sadd.s32 1, %s719_s22  ;;  %s151_s27 = sadd.s32 1, %s711_s20 }
   0x6   : > { %p32_p0 = scmp.ge.s32.totalorder %s30_s26, 2  ;;  %p161_p1 = scmp.ne.s32.totalorder %s711_s20, %s707_s19 }
   0x7   : > { %p162_p2 = scmp.eq.s32.totalorder %s565_s24, 1  ;;  %p167_p3 = scmp.ne.s32.totalorder %s707_s19, %s703_s18 }
   0x8   : > { %s893_s26 = smov (%p32_p0, %s30_s26), 0  ;;  %p168_p5 = scmp.eq.s32.totalorder %s566_s25, 1 }
   0x9   : > { %p798_p4 = por %p162_p2, %p161_p1  ;;  %s146_s29 = ssub.s32 %s719_s22, %s893_s26 }
   0xa   : > { %p569_p6 = scmp.ge.s32.totalorder %s723_s23, 1  ;;  %p149_p7 = scmp.eq.s32.totalorder %s146_s29, 0 }
   0xb   : > { %p805_p8 = por %p168_p5, %p167_p3  ;;  %p211_p9 = scmp.lt.s32.totalorder %s723_s23, 3 }
   0xc   : > { %s811_s6 = scalar_select %p149_p7, %s711_s20, %s151_s27  }
   0xd   : > { %p212_p10 = pnand %p569_p6, %p211_p9 }
   0xe   : > { %p244_p11 = scmp.lt.s32.totalorder (!%p212_p10), %s715_s21, 1  ;;  %s586_s11 = sshll.u32 (!%p212_p10), %s715_s21, 7 }
   0xf   : > { %215 = sbr.rel (%p212_p10) target bundleno = 456 (0x1c8), region = 40  ;;  %s487_s16 = scalar_lea.hbm (!%p212_p10), %s884_s5, %s586_s11 }
  0x10   : > { %s727_s25 = smov (!%p212_p10), [#allocation2]  }
  0x11   : > { %s651_s27 = sshll.u32 (!%p212_p10), %s727_s25, 4  ;;  %s652_s27 = int_to_ptr.vmem [resolvable:$false] %s651_s27 }
  0x14   : > { %v725_v0 = vmov 0.0   ;;  %v726_v1 = vmov 0   ;;  %v257_v2 = vld [vmem:[%s881_s2 + $0x8] sm:$0xf]  ;;  %s245_s9 = scalar_select %p244_p11, %s715_s21, 1  ;;  %v256_v3 = vld [vmem:[%s881_s2] sm:$0xff] }
  0x15   : > { %349 = vmatprep.mubr.f32.mxu0 %v725_v0  ;;  %644 = vset.pattern.permute.xlu0 %v726_v1  ;;  %vm280_vm0 = vcmask 1043456   ;;  %v254_v6 = vld [vmem:[%s880_s1] sm:$0xff]  ;;  %vm273_vm1 = vcmask 31744   ;;  %v255_v7 = vld [vmem:[%s880_s1 + $0x8] sm:$0xf]  ;;  %vm383_vm2 = vcmask 97280  }
  0x16   : > { %268 = vperm.xlu0 %644, %v257_v2   ;;  %457 = vmatprep.mubr.f32.mxu1 %v725_v0  ;;  %s585_s12 = sshll.u32 %s245_s9, 3  ;;  %v259_v8 = vld [vmem:[%s883_s4] sm:$0xf]  ;;  %s240_s9 = sand.u32 1, %s707_s19  }
  0x17   : > { %645 = vset.pattern.permute.xlu1 %v726_v1  ;;  %s251_s15 = scalar_lea.vmem %s879_s0, %s585_s12  ;;  %v258_v35 = vld [vmem:[%s882_s3] sm:$0xf]  ;;  %s570_s10 = sshll.u32 %s240_s9, 3 }
  0x18   : > { %v260_v4 = vld [vmem:[%s251_s15] sm:$0xff]  ;;  %380 = vperm.xlu1 %645, %v259_v8   ;;  %s242_s12 = scalar_lea.vmem [#allocation2], %s570_s10  ;;  %s473_s17 = scalar_lea.sflag [#allocation3], %s240_s9 }
  0x19   : > { %v272_v5 = vcombine.high %v260_v4, %v260_v4  ;;  %s489_s13 = sshll.u32 %s242_s12, 4  ;;  %s653_s21 = scalar_lea.vmem %s652_s27, 256  ;;  %s490_s13 = int_to_ptr.vmem [resolvable:$true] %s489_s13 }
  0x1a   : > { %263 = vperm.xlu0 %644, %v256_v3   ;;  %s647_s24 = scalar_lea.vmem %s490_s13, 128  ;;  %p654_p1 = scmp.lt.s32.totalorder %s490_s13, %s652_s27 }
  0x1b   : > { %573 = vmatprep.subr.msk.mxu0 %vm280_vm0, %v272_v5  ;;  %p648_p12 = scmp.ne.s32.totalorder %s490_s13, %s647_s24  ;;  %p655_p2 = scmp.lt.s32.totalorder %s653_s21, %s647_s24 }
  0x1c   : > { %574 = vmatpush1.msk.msra.mxu0 %vm280_vm0, %v260_v4 }
  0x1d   : > { %575 = vmatmul.mubr.msk.f32.vlgmr.msra.gmra.mxu0 %vm273_vm1, %v254_v6  ;;  %p649_p13 = pnand %p648_p12, %p798_p4  ;;  %p656_p3 = por %p655_p2, %p654_p1 }
  0x1e   : > { %355 = vmatprep.mubr.f32.mxu0 %v725_v0 }
  0x1f   : > { %p650_p0 = pneg %p649_p13 }
  0x21   : > { %576 = vmatmul.mubr.msk.f32.gmra.mxu0 %vm273_vm1, %v255_v7  ;;  %p657_p5 = pnand %p656_p3, %p650_p0 }
  0x91   : > { %v269_v9 = vpop.permute.xlu0 %268 }
  0x93   : > { %v381_v36 = vpop.permute.xlu1 %380 }
  0x95   : > { %v264_v10 = vpop.permute.xlu0 %263 }
  0xdd   : > { %v351_v11 = vpop.f32.mrf.mxu0 }
  0xde   : > { %v352_v12 = vadd.f32 %v351_v11, %v264_v10 }
  0xdf   : > { %v353_v13 = vpop.f32.mrf.mxu0 }
  0xe0   : > { %v354_v14 = vadd.f32 %v353_v13, %v264_v10  ;;  %v362_v18 = vadd.f32 3.0, %v352_v12 }
  0xe1   : > { %v357_v15 = vpop.f32.mrf.mxu0 }
  0xe2   : > { %v363_v16 = vadd.f32 3.0, %v354_v14  ;;  %v358_v17 = vadd.f32 %v357_v15, %v269_v9  ;;  %v366_v25 = vmax.f32 %v362_v18, 0.0 }
  0xe3   : > { %v359_v19 = vpop.f32.mrf.mxu0 }
  0xe4   : > { %v364_v20 = vadd.f32 3.0, %v358_v17  ;;  %v360_v21 = vadd.f32 %v359_v19, %v269_v9  ;;  %v367_v22 = vmax.f32 %v363_v16, 0.0  ;;  %v370_v30 = vmin.f32 %v366_v25, 6.0 }
  0xe6   : > { %v368_v23 = vmax.f32 %v364_v20, 0.0  ;;  %v365_v24 = vadd.f32 3.0, %v360_v21  ;;  %v371_v28 = vmin.f32 %v367_v22, 6.0  ;;  %v374_v34 = vmul.f32 %v370_v30, %v352_v12 }
  0xe8   : > { %v369_v26 = vmax.f32 %v365_v24, 0.0  ;;  %v372_v27 = vmin.f32 %v368_v23, 6.0  ;;  %v375_v33 = vmul.f32 %v371_v28, %v354_v14 }
  0xea   : > { %v373_v29 = vmin.f32 %v369_v26, 6.0  ;;  %v376_v32 = vmul.f32 %v372_v27, %v358_v17 }
  0xec   : > { %v377_v31 = vmul.f32 %v373_v29, %v360_v21 }
  0xee   : > { %577 = vmatprep.subr.msk.mxu1 %vm280_vm0, %v377_v31 }
  0xef   : > { %578 = vmatpush1.msk.msra.mxu1 %vm280_vm0, %v376_v32 }
  0xf0   : > { %423 = vmatprep.subr.mxu1 %v375_v33 }
  0xf1   : > { %424 = vmatpush1.msra.mxu1 %v374_v34 }
  0xf2   : > { %579 = vmatmul.mubr.msk.f32.vlgmr.msra.gmra.mxu1 %vm383_vm2, %v258_v35 }
 0x1b2   : > { %v459_v37 = vpop.f32.mrf.mxu1 }
 0x1b3   : > { %v460_v38 = vadd.f32 %v459_v37, %v381_v36 }
 0x1b4   : > { %v461_v39 = vpop.f32.mrf.mxu1 }
 0x1b5   : > { %v462_v40 = vadd.f32 %v461_v39, %v381_v36  ;;  %v465_v41 = vadd.f32 %v460_v38, %v260_v4 }
 0x1b7   : > { %v466_v42 = vadd.f32 %v462_v40, %v272_v5 }
 0x1b9   : > { %v469_v43 = vcombine.low %v465_v41, %v466_v42 }
 0x1bb   : > { %471 = vst [vmem:[%s242_s12] sm:$0xff] %v469_v43 }
 0x1bc   : > { %660 = shalt.err (!%p657_p5)
}
 0x1bd   : > { %s661_s29 = scalar_lea.hbm %s487_s16, 128  ;;  %s665_s9 = scalar_lea.hbm %s884_s5, 256 }
 0x1be   : > { %p662_p6 = scmp.ne.s32.totalorder %s487_s16, %s661_s29  ;;  %p666_p10 = scmp.lt.s32.totalorder %s487_s16, %s884_s5 }
 0x1bf   : > { %p667_p11 = scmp.lt.s32.totalorder %s665_s9, %s661_s29 }
 0x1c0   : > { %p663_p7 = pnand %p662_p6, %p798_p4 }
 0x1c1   : > { %p668_p12 = por %p667_p11, %p666_p10 }
 0x1c2   : > { %p664_p9 = pneg %p663_p7 }
 0x1c4   : > { %p669_p13 = pnand %p668_p12, %p664_p9 }
 0x1c6   : > { %672 = shalt.err (!%p669_p13)
}
 0x1c7   : > { %587 = dma.vmem_to_hbm [thread:$0]  (%p798_p4), %s490_s13, 128, %s487_s16, %s473_s17  }
 0x1c8 PF: > { %p593_p0 = scmp.ge.s32.totalorder %s723_s23, 2  ;;  %s501_s12 = sand.u32 1, %s703_s18  }
 0x1c9   : > { %s502_s14 = scalar_lea.sflag [#allocation3], %s501_s12 }
 0x1ca   : > { %p590_p1 = pnand %p593_p0, %p805_p8 }
 0x1cc   : > { %p591_p2 = pneg %p590_p1 }
 0x1ce   : > { %698 = dma.done.wait (%p591_p2), %s502_s14, 128  }
 0x1cf   : > { %700 = vsyncadd (%p591_p2), %s502_s14, 4294967168  ;;  %s18_s23 = sadd.s32 1, %s723_s23   ;;  %s887_s18 = smov %s707_s19 }
 0x1d0   : > { %p15_p3 = scmp.ge.s32.totalorder %s18_s23, 4   ;;  %s888_s19 = smov %s711_s20 }
 0x1d1   : > { %s889_s20 = smov %s811_s6  ;;  %s890_s21 = smov %s719_s22 }
 0x1d2   : > { %s891_s22 = smov %s893_s26  ;;  %17 = sbr.rel (!%p15_p3) target bundleno = 4 (0x4), region = 75 }
 0x1d7   :  { %507 = vsyncpa [#allocation3], 1 }
 0x1d8   :  { %509 = vsyncpa [#allocation3 + $0x1], 1 }

</bundles_post_ra>
